<compile_context>
chip_gen: v5e
topology: v5e:2x2
jax: 0.10.0
libtpu: 0.0.40
codegen_flags: <defaults>
</compile_context>

<pallas_src>
import functools

import jax
import jax.numpy as jnp
from jax import lax
from jax.experimental import pallas as pl
from jax.experimental.pallas import tpu as pltpu


def _conv_relu_kernel(x_ref, w_ref, b_ref, o_ref, col_ref, *, TH, W, Cin, K):
    """One grid step = one batch element x one TH-row output tile.

    x_ref   : (1, H, W*Cin)     lane-fused full image for batch n (VMEM)
    w_ref   : (K*W*Cin, W*Cout) row-lowered conv weight (padding folded in)
    b_ref   : (1, W*Cout)       bias tiled along W
    o_ref   : (1, TH, W*Cout)   lane-dense output tile
    col_ref : (TH, K*W*Cin)     im2col slab (VMEM scratch)
    """
    t = pl.program_id(1)
    nt = pl.num_programs(1)
    row0 = pl.multiple_of(t * TH, TH)
    WC = W * Cin

    # ---- im2col slab: col[r, kh*WC:(kh+1)*WC] = x[row0 + r + kh - 1, :] -----
    # kh = 1 (center rows): always in bounds.
    col_ref[:, WC:2 * WC] = x_ref[0, pl.ds(row0, TH), :]

    # kh = 0 (rows row0-1 .. row0+TH-2): the top halo row exists only for t>0.
    # pl.ds(row0 - 1, ...) is gated with pl.when — OOB VMEM reads are unchecked.
    @pl.when(t == 0)
    def _():
        col_ref[0:1, 0:WC] = jnp.zeros((1, WC), dtype=col_ref.dtype)
        col_ref[1:TH, 0:WC] = x_ref[0, pl.ds(0, TH - 1), :]

    @pl.when(t > 0)
    def _():
        col_ref[:, 0:WC] = x_ref[0, pl.ds(row0 - 1, TH), :]

    # kh = 2 (rows row0+1 .. row0+TH): the bottom halo row exists for t<nt-1.
    @pl.when(t == nt - 1)
    def _():
        col_ref[0:TH - 1, 2 * WC:3 * WC] = x_ref[0, pl.ds(row0 + 1, TH - 1), :]
        col_ref[TH - 1:TH, 2 * WC:3 * WC] = jnp.zeros((1, WC), dtype=col_ref.dtype)

    @pl.when(t < nt - 1)
    def _():
        col_ref[:, 2 * WC:3 * WC] = x_ref[0, pl.ds(row0 + 1, TH), :]

    # ---- one fused MXU contraction + bias + ReLU, one lane-dense store ------
    acc = jnp.dot(col_ref[...], w_ref[...], preferred_element_type=jnp.float32)
    acc = jnp.maximum(acc + b_ref[...], 0.0)
    o_ref[0] = acc.astype(o_ref.dtype)


def _pick_row_tile(N, H, max_rows=512):
    """Output-row tile TH (divides H; TH % 8 == 0 or TH == H).

    Fewer grid steps win at module-sized shapes (~0.35 us fixed overhead per
    step) and a larger TH fills more MXU rows, so take the whole H unless it is
    very large or the batch alone cannot feed two TensorCores (v7x has 2).
    """
    # TODO(synk): for tiny H with N == 1, fold multiple batch rows into one
    # matmul M dimension (zero-masking cross-image boundary rows) to reach
    # TH >= 128 MXU rows.
    if N >= 2 and H <= max_rows:
        return H
    legal = [d for d in range(8, H)
             if H % d == 0 and d % 8 == 0 and d <= max_rows]
    return max(legal) if legal else H


def _vmem_limit_bytes():
    """~75% of this chip's physical VMEM (v5e/v6e: 128 MiB, v7x: 64 MiB)."""
    cap = 64 * 1024 * 1024
    try:
        cap = int(pltpu.get_tpu_info().vmem_capacity_bytes)
    except Exception:
        pass
    return min(int(0.75 * cap), 100 * 1024 * 1024)


def make_conv_relu_params(weight, bias, W, pad=1):
    """One-time per-weight relayout (hoisted out of the per-call hot path).

    Row-lowered weight:
      w_mat[kh*W*Cin + wi*Cin + ci, wo*Cout + co] = weight[co, ci, kh, wi-wo+pad]
    for |wi - wo| <= pad, else 0 — the padding=1 halo along W lives in the
    zeros of this matrix.  Bias is tiled along W to match the fused columns.
    """
    Cout, Cin, K, K2 = weight.shape
    assert K == K2 == 3 and pad == 1, "kernel written for module default k=3, padding=1"
    w_t = jnp.transpose(weight, (2, 3, 1, 0))               # (K, K, Cin, Cout)
    wi = jnp.arange(W)[None, :, None]
    wo = jnp.arange(W)[None, None, :]
    kw = jnp.arange(K)[:, None, None]
    sel = (wi - wo + pad == kw).astype(weight.dtype)         # (K, W, W)
    w_mat = jnp.einsum('kxw,hkio->hxiwo', sel, w_t,
                       precision=lax.Precision.HIGHEST)
    w_mat = w_mat.reshape(K * W * Cin, W * Cout)
    b_row = jnp.tile(bias, W).reshape(1, W * Cout)
    return w_mat, b_row


@functools.partial(jax.jit, static_argnames=("cin", "cout"))
def conv_relu_fused(x_fused, w_mat, b_row, *, cin, cout):
    """ConvRelu on lane-fused activations: (N, H, W*cin) -> (N, H, W*cout)."""
    N, H, WCin = x_fused.shape
    W = WCin // cin
    K = 3
    TH = _pick_row_tile(N, H)
    grid = (N, H // TH)
    kernel = functools.partial(_conv_relu_kernel, TH=TH, W=W, Cin=cin, K=K)

    # TODO(synk): on v5e, once W*cin exceeds the 128-deep MXU the zero band of
    # the row-lowered weight costs real extra passes — add a W-column-tiled /
    # per-shift (pltpu.roll) fallback.  Likewise tile the W*cout columns (and
    # single-buffer the constant weight block, e.g. pl.Buffered(1)) before
    # 12*W^2*cin*cout bytes approaches the v7x 64 MiB VMEM ceiling.
    return pl.pallas_call(
        kernel,
        out_shape=jax.ShapeDtypeStruct((N, H, W * cout), x_fused.dtype),
        grid_spec=pltpu.PrefetchScalarGridSpec(
            num_scalar_prefetch=0,
            grid=grid,
            in_specs=[
                # Full image per batch element; block index ignores t, so it is
                # fetched once per n and stays resident across the row tiles.
                pl.BlockSpec((1, H, W * cin), lambda n, t: (n, 0, 0)),
                # Constant-index operands: fetched once, reused every step.
                pl.BlockSpec((K * W * cin, W * cout), lambda n, t: (0, 0)),
                pl.BlockSpec((1, W * cout), lambda n, t: (0, 0)),
            ],
            out_specs=pl.BlockSpec((1, TH, W * cout), lambda n, t: (n, t, 0)),
            scratch_shapes=[
                pltpu.VMEM((TH, K * W * cin), x_fused.dtype),
            ],
        ),
        compiler_params=pltpu.CompilerParams(
            dimension_semantics=("parallel", "parallel"),
            vmem_limit_bytes=_vmem_limit_bytes(),
        ),
    )(x_fused, w_mat, b_row)


def conv_relu(x_nchw, weight, bias):
    """Drop-in ConvRelu forward, NCHW in / NCHW out (module semantics).

    The NCHW<->fused transposes here are layout glue only — a stack of ConvRelu
    layers should stay in the fused (N, H, W*C) layout and call conv_relu_fused
    directly, reusing the make_conv_relu_params output per weight.
    """
    N, Cin, H, W = x_nchw.shape
    Cout = weight.shape[0]
    w_mat, b_row = make_conv_relu_params(weight, bias, W)
    x_fused = jnp.transpose(x_nchw, (0, 2, 3, 1)).reshape(N, H, W * Cin)
    out_fused = conv_relu_fused(x_fused, w_mat, b_row, cin=Cin, cout=Cout)
    return jnp.transpose(out_fused.reshape(N, H, W, Cout), (0, 3, 1, 2))


if __name__ == "__main__":
    # ConvRelu(in_channels=4, out_channels=8, kernel_size=3), NCHW input.
    N, Cin, H, W = 2, 4, 16, 16
    Cout, K = 8, 3

    key = jax.random.PRNGKey(0)
    kx, kw_, kb = jax.random.split(key, 3)
    x = jax.random.normal(kx, (N, Cin, H, W), dtype=jnp.float32)
    weight = 0.1 * jax.random.normal(kw_, (Cout, Cin, K, K), dtype=jnp.float32)
    bias = 0.1 * jax.random.normal(kb, (Cout,), dtype=jnp.float32)

    out = conv_relu(x, weight, bias)
    out = jax.block_until_ready(out)

    # Reference: XLA conv with the same semantics (nn.Conv2d padding=1 + ReLU).
    ref = lax.conv_general_dilated(
        x, weight, window_strides=(1, 1), padding=((1, 1), (1, 1)),
        dimension_numbers=("NCHW", "OIHW", "NCHW"),
    ) + bias.reshape(1, Cout, 1, 1)
    ref = jnp.maximum(ref, 0.0)

    assert out.shape == (N, Cout, H, W)
    max_err = float(jnp.max(jnp.abs(out - ref)))
    assert jnp.allclose(out, ref, atol=2e-4, rtol=2e-4), max_err

    print("KERNEL_OK")
</pallas_src>

<mosaic_0001>
module attributes {stable_mosaic.version = 11 : i64} {
  func.func @_conv_relu_kernel(%arg0: i32, %arg1: i32, %arg2: memref<1x16x64xf32, #tpu.memory_space<vmem>>, %arg3: memref<192x128xf32, #tpu.memory_space<vmem>>, %arg4: memref<1x128xf32, #tpu.memory_space<vmem>>, %arg5: memref<1x16x128xf32, #tpu.memory_space<vmem>>, %arg6: memref<16x192xf32, #tpu.memory_space<vmem>>) attributes {dimension_semantics = [#tpu.dimension_semantics<parallel>, #tpu.dimension_semantics<parallel>], iteration_bounds = array<i64: 2, 1>, scalar_prefetch = 0 : i64, scratch_operands = 1 : i64, tpu.core_type = #tpu.core_type<tc>, window_params = [{transform_indices = @transform_0, window_bounds = array<i64: 1, 16, 64>}, {pipeline_mode = #tpu.pipeline_mode<synchronous>, transform_indices = @transform_1, window_bounds = array<i64: 192, 128>}, {pipeline_mode = #tpu.pipeline_mode<synchronous>, transform_indices = @transform_2, window_bounds = array<i64: 1, 128>}, {transform_indices = @transform_3, window_bounds = array<i64: 1, 16, 128>}]} {
    %c16_i32 = arith.constant 16 : i32
    %0 = arith.muli %arg1, %c16_i32 : i32
    %1 = tpu.assume_multiple %0, 16 : i32
    %c0 = arith.constant 0 : index
    %2 = arith.index_cast %1 : i32 to index
    %c0_0 = arith.constant 0 : index
    %3 = vector.load %arg2[%c0, %2, %c0_0] : memref<1x16x64xf32, #tpu.memory_space<vmem>>, vector<1x16x64xf32>
    %4 = vector.shape_cast %3 : vector<1x16x64xf32> to vector<16x64xf32>
    %c0_1 = arith.constant 0 : index
    %c64 = arith.constant 64 : index
    %5 = vector.load %arg6[%c0_1, %c64] : memref<16x192xf32, #tpu.memory_space<vmem>>, vector<16x64xf32>
    tpu.vector_store %arg6[%c0_1, %c64], %4 {strides = array<i32>} : memref<16x192xf32, #tpu.memory_space<vmem>>, vector<16x64xf32>,
    %c0_i32 = arith.constant 0 : i32
    %6 = arith.cmpi eq, %arg1, %c0_i32 : i32
    %7 = arith.extui %6 : i1 to i32
    %c0_i32_2 = arith.constant 0 : i32
    %8 = arith.cmpi ne, %7, %c0_i32_2 : i32
    scf.if %8 {
      %cst_19 = arith.constant 0.000000e+00 : f32
      %29 = vector.broadcast %cst_19 : f32 to vector<1x64xf32>
      %c0_20 = arith.constant 0 : index
      %c0_21 = arith.constant 0 : index
      %30 = vector.load %arg6[%c0_20, %c0_21] : memref<16x192xf32, #tpu.memory_space<vmem>>, vector<1x64xf32>
      tpu.vector_store %arg6[%c0_20, %c0_21], %29 {strides = array<i32>} : memref<16x192xf32, #tpu.memory_space<vmem>>, vector<1x64xf32>,
      %c0_22 = arith.constant 0 : index
      %c0_23 = arith.constant 0 : index
      %c0_24 = arith.constant 0 : index
      %31 = vector.load %arg2[%c0_22, %c0_23, %c0_24] : memref<1x16x64xf32, #tpu.memory_space<vmem>>, vector<1x15x64xf32>
      %32 = vector.shape_cast %31 : vector<1x15x64xf32> to vector<15x64xf32>
      %c1 = arith.constant 1 : index
      %c0_25 = arith.constant 0 : index
      %33 = vector.load %arg6[%c1, %c0_25] : memref<16x192xf32, #tpu.memory_space<vmem>>, vector<15x64xf32>
      tpu.vector_store %arg6[%c1, %c0_25], %32 {strides = array<i32>} : memref<16x192xf32, #tpu.memory_space<vmem>>, vector<15x64xf32>,
    } else {
    }
    %c0_i32_3 = arith.constant 0 : i32
    %9 = arith.cmpi sgt, %arg1, %c0_i32_3 : i32
    %10 = arith.extui %9 : i1 to i32
    %c0_i32_4 = arith.constant 0 : i32
    %11 = arith.cmpi ne, %10, %c0_i32_4 : i32
    scf.if %11 {
      %c1_i32 = arith.constant 1 : i32
      %29 = arith.subi %1, %c1_i32 : i32
      %c0_19 = arith.constant 0 : index
      %30 = arith.index_cast %29 : i32 to index
      %c0_20 = arith.constant 0 : index
      %31 = vector.load %arg2[%c0_19, %30, %c0_20] : memref<1x16x64xf32, #tpu.memory_space<vmem>>, vector<1x16x64xf32>
      %32 = vector.shape_cast %31 : vector<1x16x64xf32> to vector<16x64xf32>
      %c0_21 = arith.constant 0 : index
      %c0_22 = arith.constant 0 : index
      %33 = vector.load %arg6[%c0_21, %c0_22] : memref<16x192xf32, #tpu.memory_space<vmem>>, vector<16x64xf32>
      tpu.vector_store %arg6[%c0_21, %c0_22], %32 {strides = array<i32>} : memref<16x192xf32, #tpu.memory_space<vmem>>, vector<16x64xf32>,
    } else {
    }
    %c0_i32_5 = arith.constant 0 : i32
    %12 = arith.cmpi eq, %arg1, %c0_i32_5 : i32
    %13 = arith.extui %12 : i1 to i32
    %c0_i32_6 = arith.constant 0 : i32
    %14 = arith.cmpi ne, %13, %c0_i32_6 : i32
    scf.if %14 {
      %c1_i32 = arith.constant 1 : i32
      %29 = arith.addi %1, %c1_i32 : i32
      %c0_19 = arith.constant 0 : index
      %30 = arith.index_cast %29 : i32 to index
      %c0_20 = arith.constant 0 : index
      %31 = vector.load %arg2[%c0_19, %30, %c0_20] : memref<1x16x64xf32, #tpu.memory_space<vmem>>, vector<1x15x64xf32>
      %32 = vector.shape_cast %31 : vector<1x15x64xf32> to vector<15x64xf32>
      %c0_21 = arith.constant 0 : index
      %c128 = arith.constant 128 : index
      %33 = vector.load %arg6[%c0_21, %c128] : memref<16x192xf32, #tpu.memory_space<vmem>>, vector<15x64xf32>
      tpu.vector_store %arg6[%c0_21, %c128], %32 {strides = array<i32>} : memref<16x192xf32, #tpu.memory_space<vmem>>, vector<15x64xf32>,
      %cst_22 = arith.constant 0.000000e+00 : f32
      %34 = vector.broadcast %cst_22 : f32 to vector<1x64xf32>
      %c15 = arith.constant 15 : index
      %c128_23 = arith.constant 128 : index
      %35 = vector.load %arg6[%c15, %c128_23] : memref<16x192xf32, #tpu.memory_space<vmem>>, vector<1x64xf32>
      tpu.vector_store %arg6[%c15, %c128_23], %34 {strides = array<i32>} : memref<16x192xf32, #tpu.memory_space<vmem>>, vector<1x64xf32>,
    } else {
    }
    %c0_i32_7 = arith.constant 0 : i32
    %15 = arith.cmpi slt, %arg1, %c0_i32_7 : i32
    %16 = arith.extui %15 : i1 to i32
    %c0_i32_8 = arith.constant 0 : i32
    %17 = arith.cmpi ne, %16, %c0_i32_8 : i32
    scf.if %17 {
      %c1_i32 = arith.constant 1 : i32
      %29 = arith.addi %1, %c1_i32 : i32
      %c0_19 = arith.constant 0 : index
      %30 = arith.index_cast %29 : i32 to index
      %c0_20 = arith.constant 0 : index
      %31 = vector.load %arg2[%c0_19, %30, %c0_20] : memref<1x16x64xf32, #tpu.memory_space<vmem>>, vector<1x16x64xf32>
      %32 = vector.shape_cast %31 : vector<1x16x64xf32> to vector<16x64xf32>
      %c0_21 = arith.constant 0 : index
      %c128 = arith.constant 128 : index
      %33 = vector.load %arg6[%c0_21, %c128] : memref<16x192xf32, #tpu.memory_space<vmem>>, vector<16x64xf32>
      tpu.vector_store %arg6[%c0_21, %c128], %32 {strides = array<i32>} : memref<16x192xf32, #tpu.memory_space<vmem>>, vector<16x64xf32>,
    } else {
    }
    %c0_9 = arith.constant 0 : index
    %c0_10 = arith.constant 0 : index
    %18 = vector.load %arg6[%c0_9, %c0_10] : memref<16x192xf32, #tpu.memory_space<vmem>>, vector<16x192xf32>
    %c0_11 = arith.constant 0 : index
    %c0_12 = arith.constant 0 : index
    %19 = vector.load %arg3[%c0_11, %c0_12] : memref<192x128xf32, #tpu.memory_space<vmem>>, vector<192x128xf32>
    %cst = arith.constant dense<0.000000e+00> : vector<16x128xf32>
    %20 = tpu.matmul %18, %19, %cst {dimension_numbers = #tpu.dot_dimension_numbers<[1], [0], [0], [1], [0, 0, 1, 1], [], []>} : vector<16x192xf32>, vector<192x128xf32>, vector<16x128xf32> -> vector<16x128xf32>
    %c0_13 = arith.constant 0 : index
    %c0_14 = arith.constant 0 : index
    %21 = vector.load %arg4[%c0_13, %c0_14] : memref<1x128xf32, #tpu.memory_space<vmem>>, vector<1x128xf32>
    %22 = vector.broadcast %21 : vector<1x128xf32> to vector<16x128xf32>
    %23 = arith.addf %20, %22 : vector<16x128xf32>
    %cst_15 = arith.constant 0.000000e+00 : f32
    %24 = vector.broadcast %cst_15 : f32 to vector<16x128xf32>
    %25 = arith.maximumf %23, %24 : vector<16x128xf32>
    %c0_16 = arith.constant 0 : index
    %c0_17 = arith.constant 0 : index
    %c0_18 = arith.constant 0 : index
    %26 = vector.load %arg5[%c0_16, %c0_17, %c0_18] : memref<1x16x128xf32, #tpu.memory_space<vmem>>, vector<1x16x128xf32>
    %27 = vector.shape_cast %26 : vector<1x16x128xf32> to vector<16x128xf32>
    %28 = vector.shape_cast %25 : vector<16x128xf32> to vector<1x16x128xf32>
    tpu.vector_store %arg5[%c0_16, %c0_17, %c0_18], %28 {strides = array<i32>} : memref<1x16x128xf32, #tpu.memory_space<vmem>>, vector<1x16x128xf32>,
    return
  }
  func.func @transform_0(%arg0: i32, %arg1: i32) -> (i32, i32, i32) {
    %c0_i32 = arith.constant 0 : i32
    %c0_i32_0 = arith.constant 0 : i32
    %c0_i32_1 = arith.constant 0 : i32
    return %arg0, %c0_i32, %c0_i32_0 : i32, i32, i32
  }
  func.func @transform_1(%arg0: i32, %arg1: i32) -> (i32, i32) {
    %c0_i32 = arith.constant 0 : i32
    %c0_i32_0 = arith.constant 0 : i32
    %c0_i32_1 = arith.constant 0 : i32
    return %c0_i32, %c0_i32_0 : i32, i32
  }
  func.func @transform_2(%arg0: i32, %arg1: i32) -> (i32, i32) {
    %c0_i32 = arith.constant 0 : i32
    %c0_i32_0 = arith.constant 0 : i32
    %c0_i32_1 = arith.constant 0 : i32
    return %c0_i32, %c0_i32_0 : i32, i32
  }
  func.func @transform_3(%arg0: i32, %arg1: i32) -> (i32, i32, i32) {
    %c0_i32 = arith.constant 0 : i32
    %c0_i32_0 = arith.constant 0 : i32
    return %arg0, %arg1, %c0_i32 : i32, i32, i32
  }
}

</mosaic_0001>

<bundles_post_ra>
// kernel: conv_relu_fused.1
= control target key start
LH: loop header
LB: loop body
LE: loop exit
PB: predicated region body
PF: predicated region fallthrough
CT: control target
= control target key end

     0   :  { %s980_s0 = inlined_call_operand.hbm [shape: f32[2,16,64], index: 0, kind: input, shape index: {}]   ;;  %s981_s1 = inlined_call_operand.hbm [shape: f32[192,128], index: 1, kind: input, shape index: {}]   ;;  %s982_s2 = inlined_call_operand.vmem [shape: f32[1,128], index: 2, kind: input, shape index: {}]   ;;  %s983_s3 = inlined_call_operand.hbm [shape: f32[2,16,128], index: 3, kind: output, shape index: {}]  }
   0x1   :  { %985 = sst [smem:[#allocation12_spill]] %s981_s1 }
   0x2   :  { %8 = vsyncpa [#allocation4], 0 }
   0x3   :  { %10 = vsyncpa [#allocation4 + $0x1], 0 }
   0x4   :  { %11 = vsyncpa [#allocation7], 0 }
   0x5   :  { %12 = vsyncpa [#allocation5], 0 }
   0x6   :  { %14 = vsyncpa [#allocation5 + $0x1], 0  ;;  %s801_s12 = smov 0   ;;  %s803_s13 = smov 0  }
   0x7   :  { %s805_s14 = smov 0   ;;  %s807_s15 = smov 0  }
   0x8   :  { %s809_s16 = smov 0   ;;  %s811_s17 = smov 0  }
   0x9 LB: > { %s503_s18 = sadd.s32 4294967295, %s772_s17   ;;  %s504_s19 = sadd.s32 4294967294, %s772_s17   ;;  %s772_s17 = sphi %s811_s17, %s20_s17   ;;  %s768_s16 = sphi %s809_s16, %s999_s16   ;;  %s764_s15 = sphi %s807_s15, %s998_s15   ;;  %s760_s14 = sphi %s805_s14, %s997_s14   ;;  %s756_s13 = sphi %s803_s13, %s996_s13   ;;  %s752_s12 = sphi %s801_s12, %s995_s12  }
   0xa   : > { %p52_p0 = scmp.ne.s32.totalorder %s756_s13, %s752_s12  ;;  %p835_p1 = scmp.eq.s32.totalorder %s503_s18, 0 }
   0xb   : > { %p839_p2 = scmp.eq.s32.totalorder %s503_s18, 1  ;;  %p126_p3 = scmp.eq.s32.totalorder %s504_s19, 1 }
   0xc   : > { %p845_p4 = por %p835_p1, %p52_p0  ;;  %p505_p5 = scmp.ge.s32.totalorder %s772_s17, 1 }
   0xd   : > { %p850_p6 = por %p126_p3, %p52_p0  ;;  %p133_p7 = scmp.lt.s32.totalorder %s772_s17, 3 }
   0xe   : > { %s990_s1 = sld [smem:[#allocation12_spill]]  ;;  %s774_s28 = smov [#allocation6]  }
   0xf   : > { %p858_p8 = pnand %p505_p5, %p133_p7  ;;  %s146_s29 = sshll.u32 %s774_s28, 4  ;;  %s147_s29 = int_to_ptr.vmem [resolvable:$true] %s146_s29 }
  0x10   : > { %p507_p11 = scmp.ge.s32.totalorder %s772_s17, 2  ;;  %s984_s30 = smov 128  }
  0x11   : > { %p554_p9 = pneg %p858_p8  ;;  %s776_s4 = smov 8  }
  0x12   : > { %s32_s5 = sadd.s32 1, %s768_s16  ;;  %s39_s6 = sadd.s32 1, %s760_s14 }
  0x13   : > { %p555_p10 = pnand %p554_p9, %p835_p1  ;;  %p34_p12 = scmp.ge.s32.totalorder %s32_s5, 2 }
  0x14   : > { %s144_s26 = sshll.u32 %s990_s1, 4  ;;  %p46_p13 = scmp.ne.s32.totalorder %s760_s14, %s756_s13  ;;  %s145_s26 = int_to_ptr.hbm [resolvable:$true] %s144_s26 }
  0x15   : > { %557 = dma.hbm_to_vmem [thread:$0]  (!%p555_p10), %s145_s26, 3072, %s147_s29, [#allocation7], %s984_s30, %s984_s30, %s776_s4  }
  0x16   : > { %p47_p0 = scmp.eq.s32.totalorder %s772_s17, 0  ;;  %s1001_s5 = smov (%p34_p12, %s32_s5), 0 }
  0x17   : > { %p883_p5 = por %p839_p2, %p46_p13  ;;  %s36_s9 = ssub.s32 %s768_s16, %s1001_s5 }
  0x18   : > { %p877_p3 = por %p47_p0, %p46_p13  ;;  %p567_p7 = scmp.lt.s32.totalorder %s772_s17, 2 }
  0x19   : > { %p37_p9 = scmp.eq.s32.totalorder %s36_s9, 0  ;;  %s163_s10 = sand.u32 1, %s760_s14  }
  0x1a   : > { %s508_s11 = sshll.u32 %s163_s10, 4  ;;  %s528_s19 = sshll.u32 %s768_s16, 4 }
  0x1b   : > { %s892_s18 = scalar_select %p37_p9, %s760_s14, %s39_s6  }
  0x1c   : > { %s172_s26 = scalar_lea.hbm %s980_s0, %s528_s19  ;;  %s167_s28 = scalar_lea.vmem [#allocation3], %s508_s11 }
  0x1d   : > { %s175_s29 = sshll.u32 %s167_s28, 4  ;;  %s173_s21 = sshll.u32 %s172_s26, 4  ;;  %s176_s29 = int_to_ptr.vmem [resolvable:$true] %s175_s29  ;;  %s174_s21 = int_to_ptr.hbm [resolvable:$true] %s173_s21 }
  0x1e   : > { %p559_p2 = pnand %p567_p7, %p877_p3  ;;  %s164_s30 = scalar_lea.sflag [#allocation4], %s163_s10 }
  0x1f   : > { %s994_s1 = smov 128   ;;  %187 = sbr.rel (%p858_p8) target bundleno = 309 (0x135), region = 32 }
  0x20   : > { %561 = dma.hbm_to_vmem [thread:$0]  (!%p559_p2), %s174_s21, 256, %s176_s29, %s164_s30, %s994_s1, %s994_s1, %s776_s4  }
  0x21   : > { %s906_s6 = sand.u32 (!%p858_p8), 1, %s756_s13  }
  0x22   : > { %s512_s9 = sshll.u32 (!%p858_p8), %s906_s6, 4  ;;  %s190_s11 = scalar_lea.sflag (!%p858_p8), [#allocation4], %s906_s6 }
  0x23   : > { %s912_s7 = scalar_lea.vmem (!%p858_p8), [#allocation3], %s512_s9 }
  0x24   : > { %739 = dma.done.wait (%p845_p4), %s190_s11, 256  }
  0x25   : > { %741 = vsyncadd (%p845_p4), %s190_s11, 4294967040 }
  0x26   : > { %743 = dma.done.wait (%p835_p1), [#allocation7], 3072  }
  0x27   : > { %745 = vsyncadd (%p835_p1), [#allocation7], 4294964224  ;;  %v226_v0 = vld [vmem:[%s912_s7 + $0x8] sm:$0xff]  ;;  %s777_s1 = smov 64   ;;  %v311_v2 = vld [vmem:[#allocation6 + $0x70] sm:$0xff]  ;;  %vm256_vm0 = vcmask 523264  }
  0x28   : > { %v312_v1 = vld [vmem:[#allocation6 + $0x78] sm:$0xff]  ;;  %231 = vrot.lane.b32.xlu0 %v226_v0, %s777_s1  ;;  %v310_v3 = vld [vmem:[#allocation6 + $0x68] sm:$0xff]  ;;  %v309_v5 = vld [vmem:[#allocation6 + $0x60] sm:$0xff]  ;;  %vm242_vm1 = vcmask 516096   ;;  %v778_v21 = vmov 0.0   ;;  %vm278_vm2 = vcmask 522240  }
  0x29   : > { %530 = vmatpush.msra.mxu2 %v312_v1  ;;  %332 = vmatpush.msra.mxu0 %v312_v1  ;;  %v320_v4 = vld [vmem:[#allocation6 + $0xb8] sm:$0xff]  ;;  %v319_v6 = vld [vmem:[#allocation6 + $0xb0] sm:$0xff]  ;;  %v306_v11 = vld [vmem:[#allocation6 + $0x48] sm:$0xff]  ;;  %281 = vst.msk [vmem:[#allocation2 + $0x1f] sm:$0x1] %vm242_vm1, %v778_v21  ;;  %vm248_vm3 = vcmask 1040384  }
  0x2a   : > { %363 = vmatpush.msra.mxu1 %v320_v4  ;;  %v517_v7 = vld [vmem:[%s912_s7 + $0x1] sm:$0xff]  ;;  %v518_v29 = vld [vmem:[%s912_s7 + $0x9] sm:$0x7f]  ;;  %vm235_vm4 = vcmask 1048064   ;;  %vm254_vm5 = vcmask 523265   ;;  %s529_s27 = sshll.u32 %s764_s15, 4 }
  0x2b   : > { %531 = vmatpush.msra.mxu2 %v311_v2  ;;  %333 = vmatpush.msra.mxu0 %v311_v2  ;;  %v925_v8 = vld [vmem:[%s912_s7] sm:$0xff]  ;;  %v308_v9 = vld [vmem:[#allocation6 + $0x58] sm:$0xff]  ;;  %277 = vst.msk [vmem:[#allocation2 + $0x8] sm:$0xff] %vm256_vm0, %v517_v7  ;;  %v302_v15 = vld [vmem:[#allocation6 + $0x28] sm:$0xff]  ;;  %s396_s10 = scalar_lea.hbm %s983_s3, %s529_s27  ;;  %s221_s19 = scalar_lea.vmem [#allocation8], %s512_s9 }
  0x2c   : > { %364 = vmatpush.msra.mxu1 %v319_v6  ;;  %v307_v10 = vld [vmem:[#allocation6 + $0x50] sm:$0xff]  ;;  %v305_v12 = vld [vmem:[#allocation6 + $0x40] sm:$0xff]  ;;  %v304_v13 = vld [vmem:[#allocation6 + $0x38] sm:$0xff]  ;;  %279 = vst.msk [vmem:[#allocation2 + $0x18] sm:$0x7f] %vm278_vm2, %v518_v29  ;;  %v249_v32 = vrot.slane %v925_v8, 7 }
  0x2d   : > { %532 = vmatpush.msra.mxu2 %v310_v3  ;;  %334 = vmatpush.msra.mxu0 %v310_v3  ;;  %v303_v14 = vld [vmem:[#allocation6 + $0x30] sm:$0xff]  ;;  %v318_v16 = vld [vmem:[#allocation6 + $0xa8] sm:$0xff]  ;;  %v301_v17 = vld [vmem:[#allocation6 + $0x20] sm:$0xff]  ;;  %s397_s24 = sshll.u32 %s221_s19, 4  ;;  %s399_s25 = sshll.u32 %s396_s10, 4  ;;  %s398_s24 = int_to_ptr.vmem [resolvable:$true] %s397_s24  ;;  %s400_s25 = int_to_ptr.hbm [resolvable:$true] %s399_s25 }
  0x2e   : > { %365 = vmatpush.msra.mxu1 %v318_v16  ;;  %v317_v18 = vld [vmem:[#allocation6 + $0xa0] sm:$0xff]  ;;  %v300_v19 = vld [vmem:[#allocation6 + $0x18] sm:$0xff]  ;;  %v299_v22 = vld [vmem:[#allocation6 + $0x10] sm:$0xff]  ;;  %s383_s15 = scalar_lea.sflag [#allocation5], %s906_s6  ;;  %s700_s26 = sshra.s32 %s400_s25, 4  ;;  %s701_s26 = int_to_ptr.hbm [resolvable:$true] %s700_s26 }
  0x2f   : > { %533 = vmatpush.msra.mxu2 %v309_v5  ;;  %335 = vmatpush.msra.mxu0 %v309_v5  ;;  %v316_v20 = vld [vmem:[#allocation6 + $0x98] sm:$0xff]  ;;  %v315_v23 = vld [vmem:[#allocation6 + $0x90] sm:$0xff]  ;;  %v298_v24 = vld [vmem:[#allocation6 + $0x8] sm:$0xff]  ;;  %s702_s28 = scalar_lea.hbm %s701_s26, 16  ;;  %s706_s9 = scalar_lea.hbm %s983_s3, 32 }
  0x30   : > { %229 = vrot.lane.b32.xlu0 %v925_v8, %s777_s1  ;;  %366 = vmatpush.msra.mxu1 %v317_v18  ;;  %v314_v25 = vld [vmem:[#allocation6 + $0x88] sm:$0xff]  ;;  %v297_v26 = vld [vmem:[#allocation6] sm:$0xff]  ;;  %p703_p1 = scmp.ne.s32.totalorder %s701_s26, %s702_s28  ;;  %p707_p10 = scmp.lt.s32.totalorder %s701_s26, %s983_s3 }
  0x31   : > { %534 = vmatpush.msra.mxu2 %v308_v9  ;;  %336 = vmatpush.msra.mxu0 %v308_v9  ;;  %v313_v27 = vld [vmem:[#allocation6 + $0x80] sm:$0xff]  ;;  %v245_v31 = vld [vmem:[%s912_s7 + $0x8] sm:$0x7f]  ;;  %p708_p12 = scmp.lt.s32.totalorder %s706_s9, %s702_s28 }
  0x32   : > { %367 = vmatpush.msra.mxu1 %v316_v20  ;;  %v294_v28 = vld [vmem:[#allocation2 + $0x8] sm:$0xff]  ;;  %v250_v33 = vrot.slane %v245_v31, 7  ;;  %v625_v40 = vld [vmem:[%s982_s2] ss:$0 sm:$0xff]  ;;  %p704_p4 = pnand %p703_p1, %p883_p5 }
  0x33   : > { %535 = vmatpush.msra.mxu2 %v307_v10  ;;  %337 = vmatpush.msra.mxu0 %v307_v10  ;;  %v296_v30 = vld [vmem:[#allocation2 + $0x18] sm:$0xff]  ;;  %p709_p13 = por %p708_p12, %p707_p10 }
  0x34   : > { %368 = vmatpush.msra.mxu1 %v315_v23  ;;  %v251_v34 = vsel %vm248_vm3, %v249_v32, %v250_v33  ;;  %p705_p8 = pneg %p704_p4 }
  0x35   : > { %536 = vmatpush.msra.mxu2 %v306_v11  ;;  %338 = vmatpush.msra.mxu0 %v306_v11 }
  0x36   : > { %369 = vmatpush.msra.mxu1 %v314_v25  ;;  %p710_p0 = pnand %p709_p13, %p705_p8 }
  0x37   : > { %537 = vmatpush.msra.mxu2 %v305_v12  ;;  %339 = vmatpush.msra.mxu0 %v305_v12 }
  0x38   : > { %370 = vmatpush.msra.mxu1 %v313_v27 }
  0x39   : > { %538 = vmatpush.msra.mxu2 %v304_v13  ;;  %340 = vmatpush.msra.mxu0 %v304_v13 }
  0x3a   : > { %521 = vmatmul.msk.f32.vlgmr.msra.gmra.mxu1 %vm256_vm0, %v294_v28 }
  0x3b   : > { %539 = vmatpush.msra.mxu2 %v303_v14  ;;  %341 = vmatpush.msra.mxu0 %v303_v14 }
  0x3d   : > { %540 = vmatpush.msra.mxu2 %v302_v15  ;;  %342 = vmatpush.msra.mxu0 %v302_v15 }
  0x3f   : > { %541 = vmatpush.msra.mxu2 %v301_v17  ;;  %343 = vmatpush.msra.mxu0 %v301_v17 }
  0x41   : > { %542 = vmatpush.msra.mxu2 %v300_v19  ;;  %344 = vmatpush.msra.mxu0 %v300_v19 }
  0x42   : > { %522 = vmatmul.msk.f32.gmra.mxu1 %vm256_vm0, %v296_v30 }
  0x43   : > { %543 = vmatpush.msra.mxu2 %v299_v22  ;;  %345 = vmatpush.msra.mxu0 %v299_v22 }
  0x45   : > { %544 = vmatpush.msra.mxu2 %v298_v24  ;;  %346 = vmatpush.msra.mxu0 %v298_v24 }
  0x47   : > { %545 = vmatpush.msra.mxu2 %v297_v26  ;;  %347 = vmatpush.msra.mxu0 %v297_v26 }
  0x9a   : > { %v232_v35 = vpop.permute.xlu0 %231 }
  0x9b   : > { %237 = vst.msk [vmem:[#allocation2 + $0x10] sm:$0xff] %vm235_vm4, %v232_v35 }
  0x9c   : > { %257 = vst.msk [vmem:[#allocation2 + $0x10] sm:$0xff] %vm256_vm0, %v251_v34 }
  0xa2   : > { %v230_v36 = vpop.permute.xlu0 %229 }
  0xa3   : > { %236 = vst.msk [vmem:[#allocation2] sm:$0xff] %vm235_vm4, %v230_v36  ;;  %v295_v37 = vld [vmem:[#allocation2 + $0x10] sm:$0xff] }
  0xa4   : > { %243 = vst.msk [vmem:[#allocation2] sm:$0x1] %vm242_vm1, %v778_v21  ;;  %351 = vmatmul.f32.vlgmr.msra.gmra.mxu2 %v295_v37 }
  0xa5   : > { %255 = vst.msk [vmem:[#allocation2] sm:$0xfe] %vm254_vm5, %v249_v32 }
  0xac   : > { %v293_v38 = vld [vmem:[#allocation2] sm:$0xff] }
  0xad   : > { %348 = vmatmul.f32.vlgmr.msra.gmra.mxu0 %v293_v38 }
  0xb7   : > { %v372_v39 = vpop.f32.mrf.mxu1 }
  0xbf   : > { %v375_v42 = vpop.f32.mrf.mxu1 }
 0x127   : > { %v352_v41 = vpop.f32.mrf.mxu2 }
 0x128   : > { %v353_v43 = vadd.f32 %v625_v40, %v352_v41 }
 0x12a   : > { %v349_v44 = vpop.f32.mrf.mxu0  ;;  %v376_v45 = vadd.f32 %v375_v42, %v353_v43 }
 0x12b   : > { %v350_v46 = vadd.f32 %v625_v40, %v349_v44 }
 0x12c   : > { %v379_v47 = vmax.f32 %v376_v45, 0.0 }
 0x12d   : > { %v373_v48 = vadd.f32 %v372_v39, %v350_v46 }
 0x12e   : > { %381 = vst [vmem:[%s221_s19 + $0x8] sm:$0xff] %v379_v47 }
 0x12f   : > { %v378_v49 = vmax.f32 %v373_v48, 0.0 }
 0x131   : > { %380 = vst [vmem:[%s221_s19] sm:$0xff] %v378_v49 }
 0x132   : > { %713 = shalt.err (!%p710_p0)
}
 0x133   : > { %s779_s6 = smov 128   ;;  %s780_s1 = smov 8  }
 0x134   : > { %552 = dma.vmem_to_hbm [thread:$0]  (%p883_p5), %s398_s24, 256, %s400_s25, %s383_s15, %s779_s6, %s779_s6, %s780_s1  }
 0x135 PF: > { %s414_s20 = sand.u32 1, %s752_s12   ;;  %p563_p3 = pnand %p507_p11, %p850_p6 }
 0x136   : > { %s415_s22 = scalar_lea.sflag [#allocation5], %s414_s20 }
 0x137   : > { %p564_p7 = pneg %p563_p3 }
 0x139   : > { %747 = dma.done.wait (%p564_p7), %s415_s22, 256  }
 0x13a   : > { %749 = vsyncadd (%p564_p7), %s415_s22, 4294967040  ;;  %s20_s17 = sadd.s32 1, %s772_s17   ;;  %s995_s12 = smov %s756_s13 }
 0x13b   : > { %p17_p9 = scmp.ge.s32.totalorder %s20_s17, 4   ;;  %s996_s13 = smov %s760_s14 }
 0x13c   : > { %s997_s14 = smov %s892_s18  ;;  %s998_s15 = smov %s768_s16 }
 0x13d   : > { %s999_s16 = smov %s1001_s5  ;;  %19 = sbr.rel (!%p17_p9) target bundleno = 9 (0x9), region = 101 }
 0x142   :  { %421 = vsyncpa [#allocation4], 1 }
 0x143   :  { %423 = vsyncpa [#allocation4 + $0x1], 1 }
 0x144   :  { %424 = vsyncpa [#allocation7], 1 }
 0x145   :  { %425 = vsyncpa [#allocation5], 1 }
 0x146   :  { %427 = vsyncpa [#allocation5 + $0x1], 1 }

</bundles_post_ra>
